<compile_context>
chip_gen: v7x
topology: tpu7x:2x2x1
jax: 0.10.0
libtpu: 0.0.40
codegen_flags: <defaults>
</compile_context>

<pallas_src>
import functools

import jax
import jax.numpy as jnp
from jax.experimental import pallas as pl
from jax.experimental.pallas import tpu as pltpu

LANE = 128
SUB = 16  # sublane granularity (bf16 packs 16 rows per vreg)

# One-time hardware query (static Python values; safe at import on TPU).
_KIND = jax.devices()[0].device_kind.lower()
_NUM_TC = 2 if any(t in _KIND for t in ("v7", "7x")) else 1
_BF16_EPILOGUE_OK = any(t in _KIND for t in ("v6", "v7", "7x"))


def _round_up(a, m):
    return ((a + m - 1) // m) * m


def _net_kernel(x_ref, w1_ref, b1_ref, w2_ref, b2_ref, o_ref, *, epi_dtype):
    # Layer 1: MXU matmul (bf16 inputs, f32 accumulate), epilogue in epi_dtype
    # (bf16 on v6e/v7x, f32 on v5e which lacks bf16 VPU/EUP).
    h = jnp.dot(x_ref[...], w1_ref[...], preferred_element_type=jnp.float32)
    h = jax.nn.sigmoid(h.astype(epi_dtype) + b1_ref[...])   # (TB, H_pad), lane-dense

    # Layer 2: cast to MXU dtype (no-op when epilogue already bf16), matmul,
    # bias + sigmoid, store in out dtype (bf16 writeback by default).
    y = jnp.dot(h.astype(w2_ref.dtype), w2_ref[...],
                preferred_element_type=jnp.float32)
    y = jax.nn.sigmoid(y.astype(epi_dtype) + b2_ref[...])   # (TB, OUT_pad)

    o_ref[...] = y.astype(o_ref.dtype)


def prepare_params(w1, b1, w2, b2, *, mxu_dtype=jnp.bfloat16, epi_dtype=None):
    """One-time parameter prep: lane-pad H/D_out to 128 and cast dtypes.

    w1: (D_in, H); b1: (H,); w2: (H, D_out); b2: (D_out,)  (transposed vs PyTorch).
    Zero-padded w2 rows cancel the sigmoid(0)=0.5 activations of padded hidden
    lanes exactly, so padding preserves the math.
    """
    if epi_dtype is None:
        epi_dtype = jnp.bfloat16 if _BF16_EPILOGUE_OK else jnp.float32
    D_in, H = w1.shape
    D_out = w2.shape[1]
    h_pad = _round_up(H, LANE)
    out_pad = _round_up(D_out, LANE)

    w1_p = jnp.pad(w1, ((0, 0), (0, h_pad - H))).astype(mxu_dtype)
    b1_p = jnp.pad(b1, (0, h_pad - H)).reshape(1, h_pad).astype(epi_dtype)
    w2_p = jnp.pad(w2, ((0, h_pad - H), (0, out_pad - D_out))).astype(mxu_dtype)
    b2_p = jnp.pad(b2, (0, out_pad - D_out)).reshape(1, out_pad).astype(epi_dtype)
    params = (w1_p, b1_p, w2_p, b2_p)
    dims = (H, D_out)
    return params, dims


@functools.partial(jax.jit, static_argnames=("block_b", "out_dtype"))
def net_forward_padded(x, w1_p, b1_p, w2_p, b2_p, *, block_b=4096,
                       out_dtype=jnp.bfloat16):
    """Pallas forward pass returning the padded (b_pad, out_pad) output."""
    B, D_in = x.shape
    h_pad = w1_p.shape[1]
    out_pad = w2_p.shape[1]
    mxu_dtype = w1_p.dtype
    epi_dtype = b1_p.dtype

    # --- batch tiling: large tiles amortize per-step overhead; on v7x cap tb
    #     so the parallel batch grid has >= 2 steps (both TensorCores busy) ---
    b16 = _round_up(B, SUB)
    tb = min(_round_up(block_b, SUB), b16)
    if _NUM_TC >= 2 and b16 >= _NUM_TC * SUB:
        tb = min(tb, _round_up(-(-b16 // _NUM_TC), SUB))
    b_pad = _round_up(B, tb)

    x_p = x.astype(mxu_dtype)
    if b_pad != B:
        x_p = jnp.pad(x_p, ((0, b_pad - B), (0, 0)))

    grid = (b_pad // tb,)

    in_bytes = jnp.dtype(mxu_dtype).itemsize
    out_bytes = jnp.dtype(out_dtype).itemsize
    epi_bytes = jnp.dtype(epi_dtype).itemsize

    # Advisory cost hint (sigmoid = exp + divide -> 2 transcendentals each).
    cost = pl.CostEstimate(
        flops=2 * b_pad * (D_in * h_pad + h_pad * out_pad),
        transcendentals=2 * b_pad * (h_pad + out_pad),
        bytes_accessed=(b_pad * D_in * in_bytes                    # x
                        + (D_in * h_pad + h_pad * out_pad) * in_bytes  # weights
                        + (h_pad + out_pad) * epi_bytes            # biases
                        + b_pad * out_pad * out_bytes),            # output
    )

    # Raise scoped VMEM only when double-buffered tiles would not fit v5e's
    # 16 MiB default (v6e/v7x default is 32 MiB).
    vmem_need = (2 * tb * D_in * in_bytes            # x, double-buffered
                 + 2 * tb * out_pad * out_bytes      # out, double-buffered
                 + (D_in * h_pad + h_pad * out_pad) * in_bytes
                 + (h_pad + out_pad) * epi_bytes
                 + tb * (h_pad + out_pad) * 4)       # in-kernel f32 temporaries
    cp_kwargs = dict(dimension_semantics=("parallel",))
    if 2 * vmem_need > (12 << 20):
        cp_kwargs["vmem_limit_bytes"] = int(min(max(2 * vmem_need, 32 << 20),
                                                64 << 20))

    out = pl.pallas_call(
        functools.partial(_net_kernel, epi_dtype=epi_dtype),
        out_shape=jax.ShapeDtypeStruct((b_pad, out_pad), out_dtype),
        grid=grid,
        in_specs=[
            pl.BlockSpec((tb, D_in), lambda i: (i, 0)),        # x: tiled over batch
            pl.BlockSpec((D_in, h_pad), lambda i: (0, 0)),     # w1: VMEM-resident
            pl.BlockSpec((1, h_pad), lambda i: (0, 0)),        # b1: VMEM-resident
            pl.BlockSpec((h_pad, out_pad), lambda i: (0, 0)),  # w2: VMEM-resident
            pl.BlockSpec((1, out_pad), lambda i: (0, 0)),      # b2: VMEM-resident
        ],
        out_specs=pl.BlockSpec((tb, out_pad), lambda i: (i, 0)),
        compiler_params=pltpu.CompilerParams(**cp_kwargs),
        cost_estimate=cost,
    )(x_p, w1_p, b1_p, w2_p, b2_p)
    return out


def net_forward(x, params, dims, *, block_b=4096, out_dtype=jnp.bfloat16,
                return_padded=False):
    """Convenience wrapper. Prefer return_padded=True (slice at the consumer)
    to avoid the extra HBM pass of the trailing slice."""
    w1_p, b1_p, w2_p, b2_p = params
    _, D_out = dims
    out = net_forward_padded(x, w1_p, b1_p, w2_p, b2_p,
                             block_b=block_b, out_dtype=out_dtype)
    if return_padded:
        return out
    return out[:x.shape[0], :D_out]


def init_params(key, D_in, H, D_out):
    """Deterministic init mimicking PyTorch nn.Linear (uniform +-1/sqrt(fan_in)).

    PyTorch stores weight as (out, in); we store the transpose (in, out).
    """
    k1, k2, k3, k4 = jax.random.split(key, 4)
    bound1 = 1.0 / jnp.sqrt(D_in)
    bound2 = 1.0 / jnp.sqrt(H)
    w1 = jax.random.uniform(k1, (D_in, H), jnp.float32, -bound1, bound1)
    b1 = jax.random.uniform(k2, (H,), jnp.float32, -bound1, bound1)
    w2 = jax.random.uniform(k3, (H, D_out), jnp.float32, -bound2, bound2)
    b2 = jax.random.uniform(k4, (D_out,), jnp.float32, -bound2, bound2)
    return w1, b1, w2, b2


def _reference(x, w1, b1, w2, b2):
    return jax.nn.sigmoid(jax.nn.sigmoid(x @ w1 + b1) @ w2 + b2)


if __name__ == "__main__":
    key = jax.random.PRNGKey(0)
    kx1, kx2, kp = jax.random.split(key, 3)

    D_in, H, D_out = 4, 32, 3
    w1, b1, w2, b2 = init_params(kp, D_in, H, D_out)
    # One-time parameter prep (padding + dtype casts hoisted out of the call).
    params, dims = prepare_params(w1, b1, w2, b2)

    # Case 1: tiny batch matching the original tutorial module.
    B1 = 8
    x1 = jax.random.normal(kx1, (B1, D_in), dtype=jnp.float32)
    out1 = net_forward(x1, params, dims)
    jax.block_until_ready(out1)
    ref1 = _reference(x1, w1, b1, w2, b2)
    assert out1.shape == (B1, D_out)
    # bf16 MXU inputs / epilogue / output -> relaxed tolerance vs pure-f32 ref.
    assert jnp.allclose(out1.astype(jnp.float32), ref1, atol=2e-2), \
        "mismatch vs reference (B=8)"

    # Case 2: batch that exercises multi-step tiling + batch padding.
    B2 = 300
    x2 = jax.random.normal(kx2, (B2, D_in), dtype=jnp.float32)
    out2 = net_forward(x2, params, dims, block_b=128)   # multi-step grid
    jax.block_until_ready(out2)
    ref2 = _reference(x2, w1, b1, w2, b2)
    assert out2.shape == (B2, D_out)
    assert jnp.allclose(out2.astype(jnp.float32), ref2, atol=2e-2), \
        "mismatch vs reference (B=300)"

    print("KERNEL_OK")
</pallas_src>

<mosaic_0001>
module attributes {stable_mosaic.version = 11 : i64} {
  func.func @_net_kernel(%arg0: i32, %arg1: memref<16x4xbf16, #tpu.memory_space<vmem>>, %arg2: memref<4x128xbf16, #tpu.memory_space<vmem>>, %arg3: memref<1x128xf32, #tpu.memory_space<vmem>>, %arg4: memref<128x128xbf16, #tpu.memory_space<vmem>>, %arg5: memref<1x128xf32, #tpu.memory_space<vmem>>, %arg6: memref<16x128xbf16, #tpu.memory_space<vmem>>) attributes {dimension_semantics = [#tpu.dimension_semantics<parallel>], iteration_bounds = array<i64: 1>, scalar_prefetch = 0 : i64, scratch_operands = 0 : i64, tpu.core_type = #tpu.core_type<tc>, window_params = [{transform_indices = @transform_0, window_bounds = array<i64: 16, 4>}, {pipeline_mode = #tpu.pipeline_mode<synchronous>, transform_indices = @transform_1, window_bounds = array<i64: 4, 128>}, {pipeline_mode = #tpu.pipeline_mode<synchronous>, transform_indices = @transform_2, window_bounds = array<i64: 1, 128>}, {pipeline_mode = #tpu.pipeline_mode<synchronous>, transform_indices = @transform_3, window_bounds = array<i64: 128, 128>}, {pipeline_mode = #tpu.pipeline_mode<synchronous>, transform_indices = @transform_4, window_bounds = array<i64: 1, 128>}, {transform_indices = @transform_5, window_bounds = array<i64: 16, 128>}]} {
    %c0 = arith.constant 0 : index
    %c0_0 = arith.constant 0 : index
    %0 = vector.load %arg1[%c0, %c0_0] : memref<16x4xbf16, #tpu.memory_space<vmem>>, vector<16x4xbf16>
    %c0_1 = arith.constant 0 : index
    %c0_2 = arith.constant 0 : index
    %1 = vector.load %arg2[%c0_1, %c0_2] : memref<4x128xbf16, #tpu.memory_space<vmem>>, vector<4x128xbf16>
    %cst = arith.constant dense<0.000000e+00> : vector<16x128xf32>
    %2 = tpu.matmul %0, %1, %cst {dimension_numbers = #tpu.dot_dimension_numbers<[1], [0], [0], [1], [0, 0, 1, 1], [], []>} : vector<16x4xbf16>, vector<4x128xbf16>, vector<16x128xf32> -> vector<16x128xf32>
    %c0_3 = arith.constant 0 : index
    %c0_4 = arith.constant 0 : index
    %3 = vector.load %arg3[%c0_3, %c0_4] : memref<1x128xf32, #tpu.memory_space<vmem>>, vector<1x128xf32>
    %4 = vector.broadcast %3 : vector<1x128xf32> to vector<16x128xf32>
    %5 = arith.addf %2, %4 : vector<16x128xf32>
    %6 = arith.negf %5 : vector<16x128xf32>
    %7 = math.exp %6 : vector<16x128xf32>
    %cst_5 = arith.constant 1.000000e+00 : f32
    %8 = vector.broadcast %cst_5 : f32 to vector<16x128xf32>
    %9 = arith.addf %8, %7 : vector<16x128xf32>
    %10 = arith.divf %8, %9 : vector<16x128xf32>
    %11 = arith.truncf %10 : vector<16x128xf32> to vector<16x128xbf16>
    %c0_6 = arith.constant 0 : index
    %c0_7 = arith.constant 0 : index
    %12 = vector.load %arg4[%c0_6, %c0_7] : memref<128x128xbf16, #tpu.memory_space<vmem>>, vector<128x128xbf16>
    %cst_8 = arith.constant dense<0.000000e+00> : vector<16x128xf32>
    %13 = tpu.matmul %11, %12, %cst_8 {dimension_numbers = #tpu.dot_dimension_numbers<[1], [0], [0], [1], [0, 0, 1, 1], [], []>} : vector<16x128xbf16>, vector<128x128xbf16>, vector<16x128xf32> -> vector<16x128xf32>
    %c0_9 = arith.constant 0 : index
    %c0_10 = arith.constant 0 : index
    %14 = vector.load %arg5[%c0_9, %c0_10] : memref<1x128xf32, #tpu.memory_space<vmem>>, vector<1x128xf32>
    %15 = vector.broadcast %14 : vector<1x128xf32> to vector<16x128xf32>
    %16 = arith.addf %13, %15 : vector<16x128xf32>
    %17 = arith.negf %16 : vector<16x128xf32>
    %18 = math.exp %17 : vector<16x128xf32>
    %cst_11 = arith.constant 1.000000e+00 : f32
    %19 = vector.broadcast %cst_11 : f32 to vector<16x128xf32>
    %20 = arith.addf %19, %18 : vector<16x128xf32>
    %21 = arith.divf %19, %20 : vector<16x128xf32>
    %22 = arith.truncf %21 : vector<16x128xf32> to vector<16x128xbf16>
    %c0_12 = arith.constant 0 : index
    %c0_13 = arith.constant 0 : index
    %23 = vector.load %arg6[%c0_12, %c0_13] : memref<16x128xbf16, #tpu.memory_space<vmem>>, vector<16x128xbf16>
    tpu.vector_store %arg6[%c0_12, %c0_13], %22 {strides = array<i32>} : memref<16x128xbf16, #tpu.memory_space<vmem>>, vector<16x128xbf16>,
    return
  }
  func.func @transform_0(%arg0: i32) -> (i32, i32) {
    %c0_i32 = arith.constant 0 : i32
    %c0_i32_0 = arith.constant 0 : i32
    return %arg0, %c0_i32 : i32, i32
  }
  func.func @transform_1(%arg0: i32) -> (i32, i32) {
    %c0_i32 = arith.constant 0 : i32
    %c0_i32_0 = arith.constant 0 : i32
    %c0_i32_1 = arith.constant 0 : i32
    return %c0_i32, %c0_i32_0 : i32, i32
  }
  func.func @transform_2(%arg0: i32) -> (i32, i32) {
    %c0_i32 = arith.constant 0 : i32
    %c0_i32_0 = arith.constant 0 : i32
    %c0_i32_1 = arith.constant 0 : i32
    return %c0_i32, %c0_i32_0 : i32, i32
  }
  func.func @transform_3(%arg0: i32) -> (i32, i32) {
    %c0_i32 = arith.constant 0 : i32
    %c0_i32_0 = arith.constant 0 : i32
    %c0_i32_1 = arith.constant 0 : i32
    return %c0_i32, %c0_i32_0 : i32, i32
  }
  func.func @transform_4(%arg0: i32) -> (i32, i32) {
    %c0_i32 = arith.constant 0 : i32
    %c0_i32_0 = arith.constant 0 : i32
    %c0_i32_1 = arith.constant 0 : i32
    return %c0_i32, %c0_i32_0 : i32, i32
  }
  func.func @transform_5(%arg0: i32) -> (i32, i32) {
    %c0_i32 = arith.constant 0 : i32
    %c0_i32_0 = arith.constant 0 : i32
    return %arg0, %c0_i32 : i32, i32
  }
}

</mosaic_0001>

<bundles_post_ra>
// kernel: net_forward_padded.1
= control target key start
LH: loop header
LB: loop body
LE: loop exit
PB: predicated region body
PF: predicated region fallthrough
CT: control target
= control target key end

     0   :  { %10 = vsyncpa [#allocation3], 0  ;;  %s483_s0 = inlined_call_operand.vmem [shape: bf16[16,4], index: 0, kind: input, shape index: {}]   ;;  %s484_s1 = inlined_call_operand.vmem [shape: bf16[4,128], index: 1, kind: input, shape index: {}]   ;;  %s485_s2 = inlined_call_operand.vmem [shape: f32[1,128], index: 2, kind: input, shape index: {}]   ;;  %s486_s3 = inlined_call_operand.hbm [shape: bf16[128,128], index: 3, kind: input, shape index: {}]   ;;  %s487_s4 = inlined_call_operand.vmem [shape: f32[1,128], index: 4, kind: input, shape index: {}]   ;;  %s488_s5 = inlined_call_operand.hbm [shape: bf16[16,128], index: 5, kind: output, shape index: {}]  }
   0x1   :  { %11 = vsyncpa [#allocation4], 0  ;;  %s405_s18 = smov [#allocation2]   ;;  %s357_s22 = scalar_lea.hbm %s486_s3, 1024 }
   0x2   :  { %s23_s19 = sshll.u32 %s405_s18, 4  ;;  %p358_p0 = scmp.ne.s32.totalorder %s486_s3, %s357_s22  ;;  %s24_s19 = int_to_ptr.vmem [resolvable:$true] %s23_s19 }
   0x3   :  { %p361_p1 = scmp.lt.u32.totalorder %s357_s22, %s486_s3 }
   0x5   :  { %p363_p2 = pnand %p361_p1, %p358_p0 }
   0x7   :  { %366 = shalt.err (!%p363_p2)
}
   0x8   :  { %s367_s27 = scalar_lea.vmem %s24_s19, 1024  ;;  %p372_p4 = scmp.lt.s32.totalorder %s24_s19, %s24_s19 }
   0x9   :  { %p368_p3 = scmp.ne.s32.totalorder %s24_s19, %s367_s27  ;;  %p373_p5 = scmp.lt.s32.totalorder %s367_s27, %s367_s27 }
   0xb   :  { %p374_p6 = por %p373_p5, %p372_p4 }
   0xd   :  { %p375_p7 = pnand %p374_p6, %p368_p3 }
   0xf   :  { %378 = shalt.err (!%p375_p7)
}
  0x10   :  { %s406_s28 = smov 64   ;;  %s407_s29 = smov 4  }
  0x11   :  { %29 = dma.hbm_to_vmem [thread:$0]  %s486_s3, 1024, %s24_s19, [#allocation3], %s406_s28, %s406_s28, %s407_s29  }
  0x12   :  { %401 = dma.done.wait [#allocation3], 1024  }
  0x13   :  { %402 = vsyncadd [#allocation3], 4294966272  ;;  %v408_v0 = vmov 0.0   ;;  %vm409_vm0 = vmmov 0   ;;  %vm55_vm1 = vcmask 1041408   ;;  %v332_v3 = vld [vmem:[%s483_s0] sm:$0xff]  }
  0x14   :  { %300 = vmatprep.subr.bf16.mxu0 %v408_v0  ;;  %302 = vmatprep.mubr.msk.bf16.mxu0 %vm409_vm0, %v408_v0  ;;  %v38_v1 = vld [vmem:[%s484_s1] sm:$0x3]  ;;  %vm51_vm2 = vcmask 31744   ;;  %v334_v5 = vld [vmem:[#allocation2 + $0x8] sm:$0xff]   ;;  %v335_v6 = vld [vmem:[#allocation2 + $0x10] sm:$0xff]   ;;  %s410_s11 = smov [#allocation5]  }
  0x15   :  { %306 = vmatprep.subr.bf16.mxu1 %v408_v0  ;;  %322 = vmatprep.mubr.msk.bf16.mxu1 %vm409_vm0, %v408_v0  ;;  %v57_v2 = vsel %vm55_vm1, %v38_v1, 0  ;;  %v333_v4 = vld [vmem:[#allocation2] sm:$0xff]   ;;  %v336_v7 = vld [vmem:[#allocation2 + $0x18] sm:$0xff]   ;;  %v338_v9 = vld [vmem:[#allocation2 + $0x28] sm:$0xff]   ;;  %s252_s12 = sshll.u32 %s410_s11, 4  ;;  %s253_s12 = int_to_ptr.vmem [resolvable:$true] %s252_s12 }
  0x16   :  { %301 = vmatpush3.bf16.msra.mxu0 %v57_v2  ;;  %307 = vmatpush3.bf16.msra.mxu1 %v333_v4  ;;  %v337_v8 = vld [vmem:[#allocation2 + $0x20] sm:$0xff]   ;;  %v339_v10 = vld [vmem:[#allocation2 + $0x30] sm:$0xff]   ;;  %v340_v11 = vld [vmem:[#allocation2 + $0x38] sm:$0xff]   ;;  %p384_p9 = scmp.lt.s32.totalorder %s253_s12, %s253_s12 }
  0x17   :  { %308 = vmatprep.subr.bf16.mxu1 %v408_v0  ;;  %v264_v12 = vld [vmem:[%s485_s2] ss:$0 sm:$0xff] }
  0x18   :  { %v269_v28 = vld [vmem:[%s487_s4] ss:$0 sm:$0xff]  ;;  %s379_s4 = scalar_lea.vmem %s253_s12, 128 }
  0x19   :  { %303 = vmatmul.mubr.msk.bf16.vlgmr.msra.gmra.mrb[0].mxu0 %vm51_vm2, %v332_v3  ;;  %p380_p8 = scmp.ne.s32.totalorder %s253_s12, %s379_s4  ;;  %p385_p10 = scmp.lt.s32.totalorder %s379_s4, %s379_s4 }
  0x1a   :  { %309 = vmatpush3.bf16.msra.mxu1 %v334_v5 }
  0x1b   :  { %310 = vmatprep.subr.bf16.mxu1 %v408_v0  ;;  %p386_p11 = por %p385_p10, %p384_p9 }
  0x1d   :  { %p387_p12 = pnand %p386_p11, %p380_p8 }
  0x1e   :  { %311 = vmatpush3.bf16.msra.mxu1 %v335_v6 }
  0x1f   :  { %312 = vmatprep.subr.bf16.mxu1 %v408_v0 }
  0x22   :  { %313 = vmatpush3.bf16.msra.mxu1 %v336_v7 }
  0x23   :  { %314 = vmatprep.subr.bf16.mxu1 %v408_v0 }
  0x26   :  { %315 = vmatpush3.bf16.msra.mxu1 %v337_v8 }
  0x27   :  { %316 = vmatprep.subr.bf16.mxu1 %v408_v0 }
  0x2a   :  { %317 = vmatpush3.bf16.msra.mxu1 %v338_v9 }
  0x2b   :  { %318 = vmatprep.subr.bf16.mxu1 %v408_v0 }
  0x2e   :  { %319 = vmatpush3.bf16.msra.mxu1 %v339_v10 }
  0x2f   :  { %320 = vmatprep.subr.bf16.mxu1 %v408_v0 }
  0x32   :  { %321 = vmatpush3.bf16.msra.mxu1 %v340_v11 }
  0xec   :  { %v93_v13 = vpop.f32.mrb[0].mxu0 }
  0xed   :  { %v94_v14 = vadd.f32 %v264_v12, %v93_v13  ;;  %v304_v15 = vpop.f32.mrb[1].mxu0 }
  0xee   :  { %v96_v16 = vpop.f32.mrb[2].mxu0 }
  0xef   :  { %v267_v17 = vmul.f32 -1.442695, %v94_v14  ;;  %v97_v18 = vadd.f32 %v264_v12, %v96_v16  ;;  %v305_v19 = vpop.f32.mrb[3].mxu0 }
  0xf1   :  { %341 = vpow2.f32 %v267_v17  ;;  %v268_v20 = vmul.f32 -1.442695, %v97_v18 }
  0xf3   :  { %343 = vpow2.f32 %v268_v20 }
  0xfb   :  { %v342_v21 = vpop.eup %341 }
  0xfc   :  { %v106_v22 = vadd.f32 1.0, %v342_v21 }
  0xfd   :  { %v344_v23 = vpop.eup %343 }
  0xfe   :  { %v107_v24 = vadd.f32 1.0, %v344_v23  ;;  %345 = vrcp.f32 %v106_v22 }
 0x100   :  { %347 = vrcp.f32 %v107_v24 }
 0x108   :  { %v346_v25 = vpop.eup %345 }
 0x10a   :  { %v348_v26 = vpop.eup %347 }
 0x10b   :  { %v112_v27 = vpack.c.bf16 %v348_v26, %v346_v25 }
 0x10d   :  { %323 = vmatmul.mubr.bf16.vlgmr.msra.gmra.mrb[0].mxu1 %v112_v27 }
 0x1e0   :  { %v218_v29 = vpop.f32.mrb[0].mxu1 }
 0x1e1   :  { %v219_v30 = vadd.f32 %v269_v28, %v218_v29  ;;  %v324_v31 = vpop.f32.mrb[1].mxu1 }
 0x1e2   :  { %v221_v32 = vpop.f32.mrb[2].mxu1 }
 0x1e3   :  { %v278_v33 = vmul.f32 -1.442695, %v219_v30  ;;  %v222_v34 = vadd.f32 %v269_v28, %v221_v32  ;;  %v325_v35 = vpop.f32.mrb[3].mxu1 }
 0x1e5   :  { %349 = vpow2.f32 %v278_v33  ;;  %v279_v36 = vmul.f32 -1.442695, %v222_v34 }
 0x1e7   :  { %351 = vpow2.f32 %v279_v36 }
 0x1ef   :  { %v350_v37 = vpop.eup %349 }
 0x1f0   :  { %v231_v38 = vadd.f32 1.0, %v350_v37 }
 0x1f1   :  { %v352_v39 = vpop.eup %351 }
 0x1f2   :  { %v232_v40 = vadd.f32 1.0, %v352_v39  ;;  %353 = vrcp.f32 %v231_v38 }
 0x1f4   :  { %355 = vrcp.f32 %v232_v40 }
 0x1fc   :  { %v354_v41 = vpop.eup %353 }
 0x1fe   :  { %v356_v42 = vpop.eup %355 }
 0x1ff   :  { %v287_v43 = vpack.c.bf16 %v356_v42, %v354_v41 }
 0x201   :  { %288 = vst [vmem:[#allocation5] sm:$0xff] %v287_v43  }
 0x202   :  { %390 = shalt.err (!%p387_p12)
}
 0x203   :  { %s391_s15 = scalar_lea.hbm %s488_s5, 128 }
 0x204   :  { %p392_p13 = scmp.ne.s32.totalorder %s488_s5, %s391_s15  ;;  %p395_p0 = scmp.lt.u32.totalorder %s391_s15, %s488_s5 }
 0x206   :  { %p397_p1 = pnand %p395_p0, %p392_p13 }
 0x208   :  { %400 = shalt.err (!%p397_p1)
}
 0x209   :  { %258 = dma.vmem_to_hbm [thread:$0]  %s253_s12, 128, %s488_s5, [#allocation4], %s406_s28, %s406_s28, %s407_s29  }
 0x20a   :  { %403 = dma.done.wait [#allocation4], 128  }
 0x20b   :  { %404 = vsyncadd [#allocation4], 4294967168 }
 0x20c   :  { %262 = vsyncpa [#allocation3], 1 }
 0x20d   :  { %263 = vsyncpa [#allocation4], 1 }

</bundles_post_ra>
